<compile_context>
chip_gen: v5e
topology: v5e:2x2
jax: 0.10.0
libtpu: 0.0.40
codegen_flags: <defaults>
</compile_context>

<pallas_src>
import math

import jax
import jax.numpy as jnp
from jax.experimental import pallas as pl
from jax.experimental.pallas import tpu as pltpu

MAXPAD = 4            # largest spatial halo among candidate ops (dil_conv_5x5: pad 4)
BN_EPS = 1e-5
NUM_PRIMITIVES = 8

_MIXED_PARAM_KEYS = (
    "s3_dw1", "s3_pw1", "s3_dw2", "s3_pw2",
    "s5_dw1", "s5_pw1", "s5_dw2", "s5_pw2",
    "d3_dw", "d3_pw", "d5_dw", "d5_pw",
)


def _bn_train(x):
    # BatchNorm2d(affine=False), training mode: normalize with biased batch stats (NHWC).
    m = jnp.mean(x, axis=(0, 1, 2), keepdims=True)
    v = jnp.mean((x - m) ** 2, axis=(0, 1, 2), keepdims=True)
    return (x - m) * jax.lax.rsqrt(v + BN_EPS)


# ---------------------------------------------------------------------------
# Kernel A: ReLUConvBN  (ReLU -> 1x1 conv -> BatchNorm(affine=False))
# ---------------------------------------------------------------------------
def _relu_conv_bn_kernel(x_ref, wT_ref, o_ref):
    x = jnp.maximum(x_ref[...], 0.0)
    N, H, W, Cin = x.shape
    y = jnp.dot(x.reshape(N * H * W, Cin), wT_ref[...],
                preferred_element_type=jnp.float32)
    y = y.reshape(N, H, W, wT_ref.shape[1])
    o_ref[...] = _bn_train(y)


def relu_conv_bn(x_nhwc, wT):
    N, H, W, _ = x_nhwc.shape
    Cout = wT.shape[1]
    return pl.pallas_call(
        _relu_conv_bn_kernel,
        out_shape=jax.ShapeDtypeStruct((N, H, W, Cout), jnp.float32),
        in_specs=[pl.BlockSpec(memory_space=pltpu.MemorySpace.VMEM),
                  pl.BlockSpec(memory_space=pltpu.MemorySpace.VMEM)],
        out_specs=pl.BlockSpec(memory_space=pltpu.MemorySpace.VMEM),
    )(x_nhwc, wT)


# ---------------------------------------------------------------------------
# Kernel B: the whole cell fused — grid over present MixedOp branches of all steps.
# States live in a VMEM stack scratch; per-step sums accumulate in a VMEM accumulator.
# ---------------------------------------------------------------------------
def _avg_pool_inv_count(H, W):
    # reciprocal of the valid-element count of a 3x3 / pad=1 / count_include_pad=False window
    r = jnp.arange(H, dtype=jnp.float32)
    c = jnp.arange(W, dtype=jnp.float32)
    ch = jnp.minimum(r, 1.0) + 1.0 + jnp.minimum(float(H - 1) - r, 1.0)
    cw = jnp.minimum(c, 1.0) + 1.0 + jnp.minimum(float(W - 1) - c, 1.0)
    return (1.0 / (ch[:, None] * cw[None, :])).reshape(1, H, W, 1)


def _make_cell_kernel(plan_in_idx, step_first, step_last, n_init):
    """Build the fused-cell kernel closure over the static branch plan.

    plan_in_idx[b] : index into the state stack read by grid-branch b
    step_first[i]  : grid index of the first present branch of step i (reset acc)
    step_last[i]   : grid index of the last present branch of step i (commit state/out)
    """
    nb = len(plan_in_idx)

    def kernel(alpha_ref, inv_cnt_ref, init_ref,
               s3_dw1, s3_pw1, s3_dw2, s3_pw2,
               s5_dw1, s5_pw1, s5_dw2, s5_pw2,
               d3_dw, d3_pw, d5_dw, d5_pw,
               o_ref, states_ref, acc_ref, pad_a, pad_b):
        b = pl.program_id(0)
        _, N, H, W, C = states_ref.shape
        Wp = W + 2 * MAXPAD

        # Load the initial states into the VMEM state stack once.
        @pl.when(b == 0)
        def _load_init():
            for s in range(n_init):
                states_ref[s] = init_ref[s]

        # Reset the step accumulator at the first present branch of each step.
        is_first = (b == step_first[0])
        for fb in step_first[1:]:
            is_first = jnp.logical_or(is_first, b == fb)

        @pl.when(is_first)
        def _reset():
            acc_ref[...] = jnp.zeros_like(acc_ref)

        # Select this branch's input state (static plan -> tiny scalar select chain).
        in_idx = jnp.int32(plan_in_idx[0])
        for ib in range(1, nb):
            in_idx = jnp.where(b == ib, jnp.int32(plan_in_idx[ib]), in_idx)
        x = states_ref[in_idx]

        def fill_halo(ref, fill):
            # Only the halo slabs are written; the interior is written by the caller.
            ref[:, :MAXPAD, :, :] = jnp.full((N, MAXPAD, Wp, C), fill, jnp.float32)
            ref[:, MAXPAD + H:, :, :] = jnp.full((N, MAXPAD, Wp, C), fill, jnp.float32)
            ref[:, MAXPAD:MAXPAD + H, :MAXPAD, :] = jnp.full((N, H, MAXPAD, C), fill, jnp.float32)
            ref[:, MAXPAD:MAXPAD + H, MAXPAD + W:, :] = jnp.full((N, H, MAXPAD, C), fill, jnp.float32)

        def set_interior(ref, val):
            ref[:, MAXPAD:MAXPAD + H, MAXPAD:MAXPAD + W, :] = val

        def dwconv(pad_ref, w_ref, k, dil):
            # depthwise conv, stride 1, "same" padding p = dil*(k-1)//2
            p = dil * (k - 1) // 2
            w = w_ref[...]                                   # (k*k, C)
            acc = jnp.zeros((N, H, W, C), jnp.float32)
            for i in range(k):
                for j in range(k):
                    oh = MAXPAD - p + i * dil
                    ow = MAXPAD - p + j * dil
                    acc = acc + (pad_ref[:, oh:oh + H, ow:ow + W, :]
                                 * w[i * k + j, :].reshape(1, 1, 1, C))
            return acc

        def pwconv(val, wT_ref):
            y = jnp.dot(val.reshape(N * H * W, C), wT_ref[...],
                        preferred_element_type=jnp.float32)
            return y.reshape(N, H, W, C)

        # Shared ReLU(x) with a zero halo: consumed by sep3/sep5 stage-1 and dil3/dil5.
        fill_halo(pad_a, 0.0)
        set_interior(pad_a, jnp.maximum(x, 0.0))

        # Pools share pad_b with interior = x.
        fill_halo(pad_b, 0.0)
        set_interior(pad_b, x)

        # avg_pool_3x3 (count_include_pad=False) -> extra BN  (PRIMITIVE 2)
        s = jnp.zeros((N, H, W, C), jnp.float32)
        for i in range(3):
            for j in range(3):
                s = s + pad_b[:, MAXPAD - 1 + i:MAXPAD - 1 + i + H,
                              MAXPAD - 1 + j:MAXPAD - 1 + j + W, :]
        contrib = alpha_ref[b, 2] * _bn_train(s * inv_cnt_ref[...])

        # max_pool_3x3 -> extra BN (re-fill only the halo with -inf)  (PRIMITIVE 1)
        fill_halo(pad_b, -jnp.inf)
        mp = jnp.full((N, H, W, C), -jnp.inf, jnp.float32)
        for i in range(3):
            for j in range(3):
                mp = jnp.maximum(mp, pad_b[:, MAXPAD - 1 + i:MAXPAD - 1 + i + H,
                                           MAXPAD - 1 + j:MAXPAD - 1 + j + W, :])
        contrib = contrib + alpha_ref[b, 1] * _bn_train(mp)

        # skip_connect (stride 1 -> identity).  'none' (PRIMITIVE 0) contributes zero.
        contrib = contrib + alpha_ref[b, 3] * x

        # dil_conv_3x3 (pad 2, dil 2) and dil_conv_5x5 (pad 4, dil 2)  (PRIMITIVES 6, 7)
        contrib = contrib + alpha_ref[b, 6] * _bn_train(pwconv(dwconv(pad_a, d3_dw, 3, 2), d3_pw))
        contrib = contrib + alpha_ref[b, 7] * _bn_train(pwconv(dwconv(pad_a, d5_dw, 5, 2), d5_pw))

        # sep_conv_3x3: stage 1 reads the shared relu pad, stage 2 through pad_b  (PRIMITIVE 4)
        y1 = _bn_train(pwconv(dwconv(pad_a, s3_dw1, 3, 1), s3_pw1))
        fill_halo(pad_b, 0.0)
        set_interior(pad_b, jnp.maximum(y1, 0.0))
        contrib = contrib + alpha_ref[b, 4] * _bn_train(pwconv(dwconv(pad_b, s3_dw2, 3, 1), s3_pw2))

        # sep_conv_5x5: pad_b halo is already zero, only the interior changes  (PRIMITIVE 5)
        y1 = _bn_train(pwconv(dwconv(pad_a, s5_dw1, 5, 1), s5_pw1))
        set_interior(pad_b, jnp.maximum(y1, 0.0))
        contrib = contrib + alpha_ref[b, 5] * _bn_train(pwconv(dwconv(pad_b, s5_dw2, 5, 1), s5_pw2))

        # Single read-modify-write of the step accumulator per branch.
        acc_ref[...] += contrib

        # Commit the finished step into the state stack and the output (static plan).
        for i, lb in enumerate(step_last):
            @pl.when(b == lb)
            def _finish(i=i):
                res = acc_ref[...]
                states_ref[n_init + i] = res
                o_ref[i] = res

    return kernel


def cell_forward(init_states, alphas_sel, weight_stacks,
                 plan_in_idx, step_first, step_last):
    """Run all steps of one cell in a single pallas_call.

    init_states:   (n_init, N, H, W, C) float32  (state0 [or zeros], state1)
    alphas_sel:    (nb, 8) float32 alpha rows for the present branches (program order)
    weight_stacks: 12 arrays, each with a leading nb dim (order = _MIXED_PARAM_KEYS)
    returns:       (steps, N, H, W, C) computed step outputs
    """
    n_init, N, H, W, C = init_states.shape
    nb = alphas_sel.shape[0]
    steps = len(step_last)
    inv_cnt = _avg_pool_inv_count(H, W)

    kernel = _make_cell_kernel(tuple(plan_in_idx), tuple(step_first),
                               tuple(step_last), n_init)

    def wspec(arr):
        return pl.BlockSpec((None,) + arr.shape[1:], lambda b, a: (b, 0, 0))

    grid_spec = pltpu.PrefetchScalarGridSpec(
        num_scalar_prefetch=1,                       # alphas -> SMEM
        grid=(nb,),
        in_specs=([pl.BlockSpec((1, H, W, 1), lambda b, a: (0, 0, 0, 0)),        # inv_cnt
                   pl.BlockSpec((n_init, N, H, W, C),
                                lambda b, a: (0, 0, 0, 0, 0))]                   # init states
                  + [wspec(w) for w in weight_stacks]),
        out_specs=pl.BlockSpec((steps, N, H, W, C), lambda b, a: (0, 0, 0, 0, 0)),
        scratch_shapes=[
            pltpu.VMEM((n_init + steps, N, H, W, C), jnp.float32),               # state stack
            pltpu.VMEM((N, H, W, C), jnp.float32),                               # step accumulator
            pltpu.VMEM((N, H + 2 * MAXPAD, W + 2 * MAXPAD, C), jnp.float32),     # shared relu pad
            pltpu.VMEM((N, H + 2 * MAXPAD, W + 2 * MAXPAD, C), jnp.float32),     # pool / stage-2 pad
        ])
    return pl.pallas_call(
        kernel,
        out_shape=jax.ShapeDtypeStruct((steps, N, H, W, C), jnp.float32),
        grid_spec=grid_spec,
        compiler_params=pltpu.CompilerParams(
            dimension_semantics=("arbitrary",)),      # branch axis accumulates / carries state
    )(alphas_sel, inv_cnt, init_states, *weight_stacks)


# ---------------------------------------------------------------------------
# Pure-JAX glue: bilinear resize with align_corners=True (F.interpolate).
# ---------------------------------------------------------------------------
def bilinear_align_corners(x_nchw, out_h, out_w):
    N, C, H, W = x_nchw.shape
    if out_h == H and out_w == W:
        return x_nchw

    def coords(o, i):
        if o == 1:
            return jnp.zeros((1,), jnp.float32)
        return jnp.arange(o, dtype=jnp.float32) * ((i - 1) / (o - 1))

    hs, ws = coords(out_h, H), coords(out_w, W)
    h0 = jnp.floor(hs).astype(jnp.int32); h1 = jnp.minimum(h0 + 1, H - 1)
    w0 = jnp.floor(ws).astype(jnp.int32); w1 = jnp.minimum(w0 + 1, W - 1)
    fh = (hs - h0)[None, None, :, None]
    fw = (ws - w0)[None, None, None, :]
    g = lambda hi, wi: x_nchw[:, :, hi, :][:, :, :, wi]
    top = g(h0, w0) * (1.0 - fw) + g(h0, w1) * fw
    bot = g(h1, w0) * (1.0 - fw) + g(h1, w1) * fw
    return top * (1.0 - fh) + bot * fh


# ---------------------------------------------------------------------------
# Cell (cell_level_search.Cell) with deterministic synthetic parameters.
# ---------------------------------------------------------------------------
class CellPallas:
    def __init__(self, steps, block_multiplier, prev_prev_fmultiplier,
                 prev_fmultiplier_down, prev_fmultiplier_same, prev_fmultiplier_up,
                 filter_multiplier, key):
        self.C_in = block_multiplier * filter_multiplier
        self.C_out = filter_multiplier
        self.C_prev_prev = int(prev_prev_fmultiplier * block_multiplier)
        self._steps = steps
        self.block_multiplier = block_multiplier

        total_branches = sum(2 + i for i in range(steps))
        keys = list(jax.random.split(key, 8 + total_branches))

        def conv1x1_wT(k, cin, cout):
            # kaiming_normal_ (fan_in = cin for a 1x1 conv); stored transposed (Cin, Cout)
            return jax.random.normal(k, (cin, cout), jnp.float32) * math.sqrt(2.0 / cin)

        self.w_pre_down = self.w_pre_same = self.w_pre_up = self.w_pre_pre = None
        if prev_fmultiplier_down is not None:
            self.C_prev_down = int(prev_fmultiplier_down * block_multiplier)
            self.w_pre_down = conv1x1_wT(keys.pop(), self.C_prev_down, self.C_out)
        if prev_fmultiplier_same is not None:
            self.C_prev_same = int(prev_fmultiplier_same * block_multiplier)
            self.w_pre_same = conv1x1_wT(keys.pop(), self.C_prev_same, self.C_out)
        if prev_fmultiplier_up is not None:
            self.C_prev_up = int(prev_fmultiplier_up * block_multiplier)
            self.w_pre_up = conv1x1_wT(keys.pop(), self.C_prev_up, self.C_out)
        if prev_prev_fmultiplier != -1:
            self.w_pre_pre = conv1x1_wT(keys.pop(), self.C_prev_prev, self.C_out)

        self.mixed_params, self.ops_present = [], []
        for i in range(steps):
            for j in range(2 + i):
                if prev_prev_fmultiplier == -1 and j == 0:
                    self.mixed_params.append(None)
                    self.ops_present.append(False)
                else:
                    self.mixed_params.append(self._init_mixed(keys.pop(), self.C_out))
                    self.ops_present.append(True)
        self.num_branches = len(self.mixed_params)

        # Static cell-wide branch plan (program order over present branches of all steps):
        # which state feeds each branch, which alpha row it uses, where each step starts/ends.
        self._plan_in_idx, present_rows, present_params = [], [], []
        self._step_first, self._step_last = [], []
        offset, ib = 0, 0
        for i in range(steps):
            ns = 2 + i
            first_of_step, last_of_step = None, None
            for j in range(ns):
                if self.ops_present[offset + j]:
                    if first_of_step is None:
                        first_of_step = ib
                    last_of_step = ib
                    self._plan_in_idx.append(j)
                    present_rows.append(offset + j)
                    present_params.append(self.mixed_params[offset + j])
                    ib += 1
            self._step_first.append(first_of_step)
            self._step_last.append(last_of_step)
            offset += ns
        self._present_rows = jnp.asarray(present_rows, jnp.int32)
        # Weights stacked once across all present branches (reused every call / state list).
        self._weight_stacks = tuple(
            jnp.stack([p[k] for p in present_params], axis=0) for k in _MIXED_PARAM_KEYS)

    @staticmethod
    def _init_mixed(key, C):
        ks = jax.random.split(key, 12)

        def dw(k, ksz):     # depthwise Conv2d(C, C, ksz, groups=C): fan_in = ksz*ksz
            return jax.random.normal(k, (ksz * ksz, C), jnp.float32) * math.sqrt(2.0 / (ksz * ksz))

        def pw(k):          # pointwise Conv2d(C, C, 1): fan_in = C; stored (Cin, Cout)
            return jax.random.normal(k, (C, C), jnp.float32) * math.sqrt(2.0 / C)

        return dict(
            s3_dw1=dw(ks[0], 3), s3_pw1=pw(ks[1]), s3_dw2=dw(ks[2], 3), s3_pw2=pw(ks[3]),
            s5_dw1=dw(ks[4], 5), s5_pw1=pw(ks[5]), s5_dw2=dw(ks[6], 5), s5_pw2=pw(ks[7]),
            d3_dw=dw(ks[8], 3), d3_pw=pw(ks[9]), d5_dw=dw(ks[10], 5), d5_pw=pw(ks[11]),
        )

    @staticmethod
    def scale_dimension(dim, scale):
        assert isinstance(dim, int)
        return int((float(dim) - 1.0) * scale + 1.0) if dim % 2 else int(dim * scale)

    def prev_feature_resize(self, x_nchw, mode):
        if mode == 'down':
            h = self.scale_dimension(x_nchw.shape[2], 0.5)
            w = self.scale_dimension(x_nchw.shape[3], 0.5)
        else:
            h = self.scale_dimension(x_nchw.shape[2], 2)
            w = self.scale_dimension(x_nchw.shape[3], 2)
        return bilinear_align_corners(x_nchw, h, w)

    def __call__(self, s0, s1_down, s1_same, s1_up, n_alphas):
        # tensor args in PyTorch NCHW; n_alphas: (num_branches, 8)
        to_nhwc = lambda t: jnp.transpose(t, (0, 2, 3, 1))
        to_nchw = lambda t: jnp.transpose(t, (0, 3, 1, 2))
        n_alphas = n_alphas.astype(jnp.float32)

        size_h = size_w = None
        if s1_down is not None:
            s1_down = self.prev_feature_resize(s1_down, 'down')
            s1_down = relu_conv_bn(to_nhwc(s1_down), self.w_pre_down)
            size_h, size_w = s1_down.shape[1], s1_down.shape[2]
        if s1_same is not None:
            s1_same = relu_conv_bn(to_nhwc(s1_same), self.w_pre_same)
            size_h, size_w = s1_same.shape[1], s1_same.shape[2]
        if s1_up is not None:
            s1_up = self.prev_feature_resize(s1_up, 'up')
            s1_up = relu_conv_bn(to_nhwc(s1_up), self.w_pre_up)
            size_h, size_w = s1_up.shape[1], s1_up.shape[2]

        s0_prep = None
        if s0 is not None:
            if s0.shape[2] != size_h or s0.shape[3] != size_w:
                s0 = bilinear_align_corners(s0, size_h, size_w)
            s0_prep = to_nhwc(s0)
            if s0_prep.shape[3] != self.C_out:
                s0_prep = relu_conv_bn(s0_prep, self.w_pre_pre)

        alphas_sel = n_alphas[self._present_rows]          # (nb, 8) rows for present branches

        final_concates = []
        for s1 in (s1_down, s1_same, s1_up):
            if s1 is None:
                continue
            state0 = s0_prep if s0_prep is not None else jnp.zeros_like(s1)  # never read if s0 is None
            init_states = jnp.stack([state0, s1], axis=0)
            new_states = cell_forward(init_states, alphas_sel, self._weight_stacks,
                                      self._plan_in_idx, self._step_first, self._step_last)
            states = [state0, s1] + [new_states[i] for i in range(self._steps)]
            concat = jnp.concatenate(states[-self.block_multiplier:], axis=-1)  # channels
            final_concates.append(to_nchw(concat))
        return final_concates


if __name__ == "__main__":
    key = jax.random.PRNGKey(0)
    k_cell, k_s0, k_s1, k_a = jax.random.split(key, 4)

    steps, block_multiplier, filter_multiplier = 2, 2, 4
    cell = CellPallas(steps=steps, block_multiplier=block_multiplier,
                      prev_prev_fmultiplier=4, prev_fmultiplier_down=None,
                      prev_fmultiplier_same=4, prev_fmultiplier_up=None,
                      filter_multiplier=filter_multiplier, key=k_cell)

    # NCHW inputs: s0 is at a larger resolution -> exercises bilinear(align_corners) + pre_preprocess.
    s0 = jax.random.normal(k_s0, (2, cell.C_prev_prev, 16, 16), jnp.float32)
    s1_same = jax.random.normal(k_s1, (2, cell.C_prev_same, 8, 8), jnp.float32)
    n_alphas = jax.nn.softmax(
        jax.random.normal(k_a, (cell.num_branches, NUM_PRIMITIVES), jnp.float32), axis=-1)

    outs = cell(s0, None, s1_same, None, n_alphas)
    outs = jax.block_until_ready(outs)
    expected = (2, block_multiplier * filter_multiplier, 8, 8)
    assert len(outs) == 1 and outs[0].shape == expected, (outs[0].shape, expected)
    print("KERNEL_OK")
</pallas_src>

<mosaic_0001>
module attributes {stable_mosaic.version = 11 : i64} {
  func.func @_relu_conv_bn_kernel(%arg0: memref<2x8x8x8xf32, #tpu.memory_space<vmem>>, %arg1: memref<8x4xf32, #tpu.memory_space<vmem>>, %arg2: memref<2x8x8x4xf32, #tpu.memory_space<vmem>>) attributes {dimension_semantics = [], scalar_prefetch = 0 : i64, scratch_operands = 0 : i64, tpu.core_type = #tpu.core_type<tc>} {
    %c0 = arith.constant 0 : index
    %c0_0 = arith.constant 0 : index
    %c0_1 = arith.constant 0 : index
    %c0_2 = arith.constant 0 : index
    %0 = vector.load %arg0[%c0, %c0_0, %c0_1, %c0_2] : memref<2x8x8x8xf32, #tpu.memory_space<vmem>>, vector<2x8x8x8xf32>
    %cst = arith.constant 0.000000e+00 : f32
    %1 = vector.broadcast %cst : f32 to vector<2x8x8x8xf32>
    %2 = arith.maximumf %0, %1 : vector<2x8x8x8xf32>
    %3 = vector.shape_cast %2 : vector<2x8x8x8xf32> to vector<128x8xf32>
    %c0_3 = arith.constant 0 : index
    %c0_4 = arith.constant 0 : index
    %4 = vector.load %arg1[%c0_3, %c0_4] : memref<8x4xf32, #tpu.memory_space<vmem>>, vector<8x4xf32>
    %cst_5 = arith.constant dense<0.000000e+00> : vector<128x4xf32>
    %5 = tpu.matmul %3, %4, %cst_5 {dimension_numbers = #tpu.dot_dimension_numbers<[1], [0], [0], [1], [0, 0, 1, 1], [], []>} : vector<128x8xf32>, vector<8x4xf32>, vector<128x4xf32> -> vector<128x4xf32>
    %6 = vector.shape_cast %5 : vector<128x4xf32> to vector<2x8x8x4xf32>
    %cst_6 = arith.constant dense<0.000000e+00> : vector<4xf32>
    %7 = vector.multi_reduction <add>, %6, %cst_6 [0, 1, 2] : vector<2x8x8x4xf32> to vector<4xf32>
    %8 = vector.shape_cast %7 : vector<4xf32> to vector<1x1x1x4xf32>
    %cst_7 = arith.constant 1.280000e+02 : f32
    %9 = vector.broadcast %cst_7 : f32 to vector<1x1x1x4xf32>
    %10 = arith.divf %8, %9 : vector<1x1x1x4xf32>
    %11 = vector.broadcast %10 : vector<1x1x1x4xf32> to vector<2x8x8x4xf32>
    %12 = arith.subf %6, %11 : vector<2x8x8x4xf32>
    %13 = arith.mulf %12, %12 : vector<2x8x8x4xf32>
    %cst_8 = arith.constant dense<0.000000e+00> : vector<4xf32>
    %14 = vector.multi_reduction <add>, %13, %cst_8 [0, 1, 2] : vector<2x8x8x4xf32> to vector<4xf32>
    %15 = vector.shape_cast %14 : vector<4xf32> to vector<1x1x1x4xf32>
    %cst_9 = arith.constant 1.280000e+02 : f32
    %16 = vector.broadcast %cst_9 : f32 to vector<1x1x1x4xf32>
    %17 = arith.divf %15, %16 : vector<1x1x1x4xf32>
    %18 = vector.broadcast %10 : vector<1x1x1x4xf32> to vector<2x8x8x4xf32>
    %19 = arith.subf %6, %18 : vector<2x8x8x4xf32>
    %cst_10 = arith.constant 9.99999974E-6 : f32
    %20 = vector.broadcast %cst_10 : f32 to vector<1x1x1x4xf32>
    %21 = arith.addf %17, %20 : vector<1x1x1x4xf32>
    %22 = math.rsqrt %21 : vector<1x1x1x4xf32>
    %23 = vector.broadcast %22 : vector<1x1x1x4xf32> to vector<2x8x8x4xf32>
    %24 = arith.mulf %19, %23 : vector<2x8x8x4xf32>
    %c0_11 = arith.constant 0 : index
    %c0_12 = arith.constant 0 : index
    %c0_13 = arith.constant 0 : index
    %c0_14 = arith.constant 0 : index
    %25 = vector.load %arg2[%c0_11, %c0_12, %c0_13, %c0_14] : memref<2x8x8x4xf32, #tpu.memory_space<vmem>>, vector<2x8x8x4xf32>
    tpu.vector_store %arg2[%c0_11, %c0_12, %c0_13, %c0_14], %24 {strides = array<i32>} : memref<2x8x8x4xf32, #tpu.memory_space<vmem>>, vector<2x8x8x4xf32>,
    return
  }
}

</mosaic_0001>

<bundles_post_ra>
// kernel: tpu_custom_call.1
= control target key start
LH: loop header
LB: loop body
LE: loop exit
PB: predicated region body
PF: predicated region fallthrough
CT: control target
= control target key end

     0   :  { %7 = vsyncpa [#allocation3], 0  ;;  %s391_s12 = smov [#allocation2]   ;;  %s392_s14 = smov 128   ;;  %s650_s0 = inlined_call_operand.hbm [shape: f32[2,8,8,8], index: 0, kind: input, shape index: {}]   ;;  %s651_s1 = inlined_call_operand.vmem [shape: f32[8,4], index: 1, kind: input, shape index: {}]   ;;  %s652_s2 = inlined_call_operand.vmem [shape: f32[2,8,8,4], index: 2, kind: output, shape index: {}]  }
   0x1   :  { %s12_s11 = sshll.u32 %s650_s0, 4  ;;  %s14_s13 = sshll.u32 %s391_s12, 4  ;;  %s13_s11 = int_to_ptr.hbm [resolvable:$true] %s12_s11  ;;  %s15_s13 = int_to_ptr.vmem [resolvable:$true] %s14_s13 }
   0x2   :  { %s393_s15 = smov 8  }
   0x3   :  { %20 = dma.hbm_to_vmem [thread:$0]  %s13_s11, 2048, %s15_s13, [#allocation3], %s392_s14, %s392_s14, %s393_s15  }
   0x4   :  { %389 = dma.done.wait [#allocation3], 2048  }
   0x5   :  { %390 = vsyncadd [#allocation3], 4294965248  ;;  %v59_v0 = vld [vmem:[%s651_s1] sm:$0xff]  ;;  %vm60_vm0 = vcmask 64512   ;;  %v28_v9 = vld [vmem:[#allocation2 + $0x8] sm:$0xff]  ;;  %vm174_vm1 = vcmask 31744  }
   0x6   :  { %v27_v1 = vld [vmem:[#allocation2] sm:$0xff]  ;;  %124 = vmatpush.msra.mxu0 %v59_v0  ;;  %354 = vmatpush.msra.mxu1 %v59_v0  ;;  %v32_v10 = vld [vmem:[#allocation2 + $0x28] sm:$0xff]  ;;  %v44_v13 = vmax.f32 %v28_v9, 0.0  ;;  %v29_v17 = vld [vmem:[#allocation2 + $0x10] sm:$0xff] }
   0x7   :  { %v43_v2 = vmax.f32 %v27_v1, 0.0  ;;  %v31_v3 = vld [vmem:[#allocation2 + $0x20] sm:$0xff]  ;;  %355 = vmatpush.msra.mxu2 %v59_v0  ;;  %356 = vmatpush.msra.mxu3 %v59_v0  ;;  %v36_v11 = vld [vmem:[#allocation2 + $0x48] sm:$0xff]  ;;  %v48_v14 = vmax.f32 %v32_v10, 0.0  ;;  %v33_v18 = vld [vmem:[#allocation2 + $0x30] sm:$0xff]  ;;  %v45_v21 = vmax.f32 %v29_v17, 0.0 }
   0x8   :  { %v35_v4 = vld [vmem:[#allocation2 + $0x40] sm:$0xff]  ;;  %v47_v5 = vmax.f32 %v31_v3, 0.0  ;;  %v40_v12 = vld [vmem:[#allocation2 + $0x68] sm:$0xff]  ;;  %v52_v15 = vmax.f32 %v36_v11, 0.0  ;;  %v37_v19 = vld [vmem:[#allocation2 + $0x50] sm:$0xff]  ;;  %v49_v22 = vmax.f32 %v33_v18, 0.0 }
   0x9   :  { %v51_v6 = vmax.f32 %v35_v4, 0.0  ;;  %v39_v7 = vld [vmem:[#allocation2 + $0x60] sm:$0xff]  ;;  %338 = vmatmul.msk.f32.vlgmr.msra.gmra.mxu0 %vm60_vm0, %v43_v2  ;;  %v56_v16 = vmax.f32 %v40_v12, 0.0  ;;  %v41_v20 = vld [vmem:[#allocation2 + $0x70] sm:$0xff]  ;;  %v53_v23 = vmax.f32 %v37_v19, 0.0  ;;  %v30_v25 = vld [vmem:[#allocation2 + $0x18] sm:$0xff] }
   0xa   :  { %v55_v8 = vmax.f32 %v39_v7, 0.0  ;;  %342 = vmatmul.msk.f32.vlgmr.msra.gmra.mxu1 %vm60_vm0, %v47_v5  ;;  %v57_v24 = vmax.f32 %v41_v20, 0.0  ;;  %v34_v26 = vld [vmem:[#allocation2 + $0x38] sm:$0xff]  ;;  %v46_v29 = vmax.f32 %v30_v25, 0.0  ;;  %v394_v1 = vmov 128.0  }
   0xb   :  { %346 = vmatmul.msk.f32.vlgmr.msra.gmra.mxu2 %vm60_vm0, %v51_v6  ;;  %v38_v27 = vld [vmem:[#allocation2 + $0x58] sm:$0xff]  ;;  %v50_v30 = vmax.f32 %v34_v26, 0.0  ;;  %361 = vrcp.f32 %v394_v1 }
   0xc   :  { %350 = vmatmul.msk.f32.vlgmr.msra.gmra.mxu3 %vm60_vm0, %v55_v8  ;;  %v42_v28 = vld [vmem:[#allocation2 + $0x78] sm:$0xff]  ;;  %v54_v31 = vmax.f32 %v38_v27, 0.0 }
   0xd   :  { %v58_v32 = vmax.f32 %v42_v28, 0.0 }
  0x11   :  { %339 = vmatmul.msk.f32.gmra.mxu0 %vm60_vm0, %v44_v13  ;;  %v362_v7 = vpop.eup %361 }
  0x12   :  { %343 = vmatmul.msk.f32.gmra.mxu1 %vm60_vm0, %v48_v14  ;;  %v213_v13 = vmul.f32 128.0, %v362_v7  ;;  %vm217_vm2 = vweird.f32 %v362_v7 }
  0x13   :  { %347 = vmatmul.msk.f32.gmra.mxu2 %vm60_vm0, %v52_v15 }
  0x14   :  { %351 = vmatmul.msk.f32.gmra.mxu3 %vm60_vm0, %v56_v16  ;;  %v214_v18 = vsub.f32 1.0, %v213_v13 }
  0x19   :  { %340 = vmatmul.msk.f32.gmra.mxu0 %vm60_vm0, %v45_v21  ;;  %v215_v21 = vmul.f32 %v362_v7, %v214_v18 }
  0x1a   :  { %344 = vmatmul.msk.f32.gmra.mxu1 %vm60_vm0, %v49_v22 }
  0x1b   :  { %348 = vmatmul.msk.f32.gmra.mxu2 %vm60_vm0, %v53_v23 }
  0x1c   :  { %352 = vmatmul.msk.f32.gmra.mxu3 %vm60_vm0, %v57_v24  ;;  %v216_v24 = vadd.f32 %v362_v7, %v215_v21 }
  0x1e   :  { %v484_v27 = vsel %vm217_vm2, %v362_v7, %v216_v24 }
  0x21   :  { %341 = vmatmul.msk.f32.gmra.mxu0 %vm60_vm0, %v46_v29 }
  0x22   :  { %345 = vmatmul.msk.f32.gmra.mxu1 %vm60_vm0, %v50_v30 }
  0x23   :  { %349 = vmatmul.msk.f32.gmra.mxu2 %vm60_vm0, %v54_v31 }
  0x24   :  { %353 = vmatmul.msk.f32.gmra.mxu3 %vm60_vm0, %v58_v32 }
  0x86   :  { %v432_v33 = vpop.f32.mrf.mxu0 }
  0x87   :  { %v434_v34 = vpop.f32.mrf.mxu1  ;;  %v175_v43 = vsel %vm174_vm1, %v432_v33, 0.0 }
  0x88   :  { %v182_v52 = vsel %vm174_vm1, %v434_v34, 0.0 }
  0x8e   :  { %v436_v35 = vpop.f32.mrf.mxu2  ;;  %v129_v36 = vpop.f32.mrf.mxu0 }
  0x8f   :  { %v438_v37 = vpop.f32.mrf.mxu1  ;;  %v440_v38 = vpop.f32.mrf.mxu3  ;;  %v176_v42 = vsel %vm174_vm1, %v129_v36, 0.0  ;;  %v190_v62 = vsel %vm174_vm1, %v436_v35, 0.0 }
  0x90   :  { %v177_v45 = vadd.f32 %v176_v42, %v175_v43  ;;  %v184_v55 = vsel %vm174_vm1, %v438_v37, 0.0  ;;  %v198_v9 = vsel %vm174_vm1, %v440_v38, 0.0 }
  0x96   :  { %v132_v39 = vpop.f32.mrf.mxu0  ;;  %v442_v40 = vpop.f32.mrf.mxu2 }
  0x97   :  { %v444_v41 = vpop.f32.mrf.mxu1  ;;  %v178_v44 = vsel %vm174_vm1, %v132_v39, 0.0  ;;  %v450_v48 = vpop.f32.mrf.mxu3  ;;  %v192_v2 = vsel %vm174_vm1, %v442_v40, 0.0 }
  0x98   :  { %v179_v46 = vadd.f32 %v178_v44, %v177_v45  ;;  %v186_v57 = vsel %vm174_vm1, %v444_v41, 0.0  ;;  %v200_v12 = vsel %vm174_vm1, %v450_v48, 0.0 }
  0x9e   :  { %v135_v47 = vpop.f32.mrf.mxu0  ;;  %v453_v51 = vpop.f32.mrf.mxu2 }
  0x9f   :  { %v180_v49 = vsel %vm174_vm1, %v135_v47, 0.0  ;;  %v147_v54 = vpop.f32.mrf.mxu1  ;;  %v462_v61 = vpop.f32.mrf.mxu3  ;;  %v194_v4 = vsel %vm174_vm1, %v453_v51, 0.0 }
  0xa0   :  { %v181_v50 = vadd.f32 %v180_v49, %v179_v46  ;;  %v188_v58 = vsel %vm174_vm1, %v147_v54, 0.0  ;;  %v202_v15 = vsel %vm174_vm1, %v462_v61, 0.0 }
  0xa2   :  { %v183_v53 = vadd.f32 %v182_v52, %v181_v50 }
  0xa4   :  { %v185_v56 = vadd.f32 %v184_v55, %v183_v53 }
  0xa6   :  { %v187_v59 = vadd.f32 %v186_v57, %v185_v56  ;;  %v466_v0 = vpop.f32.mrf.mxu2 }
  0xa7   :  { %v196_v5 = vsel %vm174_vm1, %v466_v0, 0.0  ;;  %v476_v11 = vpop.f32.mrf.mxu3 }
  0xa8   :  { %v189_v60 = vadd.f32 %v188_v58, %v187_v59  ;;  %v204_v16 = vsel %vm174_vm1, %v476_v11, 0.0 }
  0xaa   :  { %v191_v63 = vadd.f32 %v190_v62, %v189_v60 }
  0xac   :  { %v193_v3 = vadd.f32 %v192_v2, %v191_v63 }
  0xae   :  { %v195_v6 = vadd.f32 %v194_v4, %v193_v3 }
  0xb0   :  { %v197_v8 = vadd.f32 %v196_v5, %v195_v6 }
  0xb2   :  { %v199_v10 = vadd.f32 %v198_v9, %v197_v8 }
  0xb4   :  { %v201_v14 = vadd.f32 %v200_v12, %v199_v10 }
  0xb6   :  { %v203_v17 = vadd.f32 %v202_v15, %v201_v14 }
  0xb8   :  { %v205_v19 = vadd.f32 %v204_v16, %v203_v17 }
  0xba   :  { %v206_v20 = vrot.slane %v205_v19, 4 }
  0xbc   :  { %v207_v22 = vadd.f32 %v206_v20, %v205_v19 }
  0xbe   :  { %v208_v23 = vrot.slane %v207_v22, 2 }
  0xc0   :  { %v209_v25 = vadd.f32 %v208_v23, %v207_v22 }
  0xc2   :  { %v210_v26 = vrot.slane %v209_v25, 1 }
  0xc4   :  { %v211_v28 = vadd.f32 %v210_v26, %v209_v25 }
  0xc6   :  { %v219_v29 = vmul.f32 %v484_v27, %v211_v28 }
  0xc8   :  { %v488_v30 = vsub.f32 %v432_v33, %v219_v29  ;;  %v490_v31 = vsub.f32 %v129_v36, %v219_v29  ;;  %v492_v32 = vsub.f32 %v132_v39, %v219_v29  ;;  %v494_v42 = vsub.f32 %v135_v47, %v219_v29 }
  0xc9   :  { %v501_v45 = vsub.f32 %v434_v34, %v219_v29  ;;  %v506_v33 = vsub.f32 %v438_v37, %v219_v29  ;;  %v513_v50 = vsub.f32 %v444_v41, %v219_v29  ;;  %v518_v55 = vsub.f32 %v147_v54, %v219_v29 }
  0xca   :  { %v236_v43 = vmul.f32 %v488_v30, %v488_v30  ;;  %v237_v44 = vmul.f32 %v490_v31, %v490_v31  ;;  %v238_v46 = vmul.f32 %v492_v32, %v492_v32  ;;  %v239_v36 = vmul.f32 %v494_v42, %v494_v42 }
  0xcb   :  { %v240_v34 = vmul.f32 %v501_v45, %v501_v45  ;;  %v241_v37 = vmul.f32 %v506_v33, %v506_v33  ;;  %v524_v58 = vsub.f32 %v436_v35, %v219_v29  ;;  %v242_v41 = vmul.f32 %v513_v50, %v513_v50 }
  0xcc   :  { %v252_v39 = vsel %vm174_vm1, %v236_v43, 0.0  ;;  %v253_v47 = vsel %vm174_vm1, %v237_v44, 0.0  ;;  %v255_v52 = vsel %vm174_vm1, %v238_v46, 0.0  ;;  %v257_v56 = vsel %vm174_vm1, %v239_v36, 0.0 }
  0xcd   :  { %v254_v49 = vadd.f32 %v253_v47, %v252_v39  ;;  %v259_v59 = vsel %vm174_vm1, %v240_v34, 0.0  ;;  %v530_v62 = vsub.f32 %v442_v40, %v219_v29  ;;  %v243_v54 = vmul.f32 %v518_v55, %v518_v55 }
  0xce   :  { %v261_v63 = vsel %vm174_vm1, %v241_v37, 0.0  ;;  %v536_v2 = vsub.f32 %v453_v51, %v219_v29  ;;  %v244_v35 = vmul.f32 %v524_v58, %v524_v58  ;;  %v263_v3 = vsel %vm174_vm1, %v242_v41, 0.0 }
  0xcf   :  { %v256_v53 = vadd.f32 %v255_v52, %v254_v49  ;;  %v542_v5 = vsub.f32 %v466_v0, %v219_v29  ;;  %v245_v40 = vmul.f32 %v530_v62, %v530_v62  ;;  %v265_v6 = vsel %vm174_vm1, %v243_v54, 0.0 }
  0xd0   :  { %v548_v8 = vsub.f32 %v440_v38, %v219_v29  ;;  %v246_v51 = vmul.f32 %v536_v2, %v536_v2  ;;  %v267_v9 = vsel %vm174_vm1, %v244_v35, 0.0  ;;  %v554_v12 = vsub.f32 %v450_v48, %v219_v29 }
  0xd1   :  { %v258_v57 = vadd.f32 %v257_v56, %v256_v53  ;;  %v247_v0 = vmul.f32 %v542_v5, %v542_v5  ;;  %v269_v13 = vsel %vm174_vm1, %v245_v40, 0.0  ;;  %v234_v15 = vsub.f32 %v462_v61, %v219_v29 }
  0xd2   :  { %v248_v38 = vmul.f32 %v548_v8, %v548_v8  ;;  %v271_v16 = vsel %vm174_vm1, %v246_v51, 0.0  ;;  %v235_v18 = vsub.f32 %v476_v11, %v219_v29  ;;  %v249_v48 = vmul.f32 %v554_v12, %v554_v12 }
  0xd3   :  { %v260_v60 = vadd.f32 %v259_v59, %v258_v57  ;;  %v273_v19 = vsel %vm174_vm1, %v247_v0, 0.0  ;;  %v250_v21 = vmul.f32 %v234_v15, %v234_v15 }
  0xd4   :  { %v275_v22 = vsel %vm174_vm1, %v248_v38, 0.0  ;;  %v251_v24 = vmul.f32 %v235_v18, %v235_v18  ;;  %v277_v61 = vsel %vm174_vm1, %v249_v48, 0.0 }
  0xd5   :  { %v262_v1 = vadd.f32 %v261_v63, %v260_v60  ;;  %v279_v26 = vsel %vm174_vm1, %v250_v21, 0.0 }
  0xd6   :  { %v281_v43 = vsel %vm174_vm1, %v251_v24, 0.0 }
  0xd7   :  { %v264_v4 = vadd.f32 %v263_v3, %v262_v1 }
  0xd9   :  { %v266_v7 = vadd.f32 %v265_v6, %v264_v4 }
  0xdb   :  { %v268_v10 = vadd.f32 %v267_v9, %v266_v7 }
  0xdd   :  { %v270_v14 = vadd.f32 %v269_v13, %v268_v10 }
  0xdf   :  { %v272_v17 = vadd.f32 %v271_v16, %v270_v14 }
  0xe1   :  { %v274_v20 = vadd.f32 %v273_v19, %v272_v17 }
  0xe3   :  { %v276_v23 = vadd.f32 %v275_v22, %v274_v20 }
  0xe5   :  { %v278_v25 = vadd.f32 %v277_v61, %v276_v23 }
  0xe7   :  { %v280_v28 = vadd.f32 %v279_v26, %v278_v25 }
  0xe9   :  { %v282_v11 = vadd.f32 %v281_v43, %v280_v28 }
  0xeb   :  { %v283_v29 = vrot.slane %v282_v11, 4 }
  0xed   :  { %v284_v44 = vadd.f32 %v283_v29, %v282_v11 }
  0xef   :  { %v285_v46 = vrot.slane %v284_v44, 2 }
  0xf1   :  { %v286_v36 = vadd.f32 %v285_v46, %v284_v44 }
  0xf3   :  { %v287_v39 = vrot.slane %v286_v36, 1 }
  0xf5   :  { %v288_v47 = vadd.f32 %v287_v39, %v286_v36 }
  0xf7   :  { %v289_v49 = vmul.f32 %v288_v47, %v484_v27 }
  0xf9   :  { %v290_v34 = vadd.f32 1e-05, %v289_v49 }
  0xfb   :  { %363 = vrsqrt.f32 %v290_v34  ;;  %vm297_vm4 = vweird.f32 %v290_v34 }
 0x101   :  { %v364_v52 = vpop.eup %363 }
 0x102   :  { %v292_v53 = vmul.f32 %v364_v52, %v290_v34  ;;  %vm298_vm3 = vweird.f32 %v364_v52 }
 0x103   :  { %vm299_vm5 = vmor %vm297_vm4, %vm298_vm3 }
 0x104   :  { %v293_v37 = vmul.f32 %v364_v52, %v292_v53 }
 0x106   :  { %v294_v56 = vmul.f32 0.5, %v293_v37 }
 0x108   :  { %v295_v57 = vsub.f32 1.5, %v294_v56 }
 0x10a   :  { %v296_v41 = vmul.f32 %v364_v52, %v295_v57 }
 0x10c   :  { %v300_v59 = vsel %vm299_vm5, %v364_v52, %v296_v41 }
 0x10d   :  { %v301_v60 = vmul.f32 %v300_v59, %v488_v30  ;;  %v302_v54 = vmul.f32 %v300_v59, %v490_v31  ;;  %v303_v63 = vmul.f32 %v300_v59, %v492_v32  ;;  %v304_v27 = vmul.f32 %v300_v59, %v494_v42 }
 0x10e   :  { %v305_v1 = vmul.f32 %v300_v59, %v501_v45  ;;  %v306_v35 = vmul.f32 %v300_v59, %v506_v33  ;;  %v307_v30 = vmul.f32 %v300_v59, %v513_v50  ;;  %v308_v31 = vmul.f32 %v300_v59, %v518_v55 }
 0x10f   :  { %317 = vst.msk [vmem:[%s652_s2] sm:$0xff] %vm174_vm1, %v301_v60  ;;  %v309_v32 = vmul.f32 %v300_v59, %v524_v58  ;;  %v310_v42 = vmul.f32 %v300_v59, %v530_v62  ;;  %v311_v45 = vmul.f32 %v300_v59, %v536_v2  ;;  %v312_v33 = vmul.f32 %v300_v59, %v542_v5 }
 0x110   :  { %318 = vst.msk [vmem:[%s652_s2 + $0x8] sm:$0xff] %vm174_vm1, %v302_v54  ;;  %v313_v50 = vmul.f32 %v300_v59, %v548_v8  ;;  %v314_v55 = vmul.f32 %v300_v59, %v554_v12  ;;  %v315_v58 = vmul.f32 %v300_v59, %v234_v15  ;;  %v316_v62 = vmul.f32 %v300_v59, %v235_v18 }
 0x111   :  { %319 = vst.msk [vmem:[%s652_s2 + $0x10] sm:$0xff] %vm174_vm1, %v303_v63 }
 0x112   :  { %320 = vst.msk [vmem:[%s652_s2 + $0x18] sm:$0xff] %vm174_vm1, %v304_v27 }
 0x113   :  { %321 = vst.msk [vmem:[%s652_s2 + $0x20] sm:$0xff] %vm174_vm1, %v305_v1 }
 0x114   :  { %322 = vst.msk [vmem:[%s652_s2 + $0x28] sm:$0xff] %vm174_vm1, %v306_v35 }
 0x115   :  { %323 = vst.msk [vmem:[%s652_s2 + $0x30] sm:$0xff] %vm174_vm1, %v307_v30 }
 0x116   :  { %324 = vst.msk [vmem:[%s652_s2 + $0x38] sm:$0xff] %vm174_vm1, %v308_v31 }
 0x117   :  { %325 = vst.msk [vmem:[%s652_s2 + $0x40] sm:$0xff] %vm174_vm1, %v309_v32 }
 0x118   :  { %326 = vst.msk [vmem:[%s652_s2 + $0x48] sm:$0xff] %vm174_vm1, %v310_v42 }
 0x119   :  { %327 = vst.msk [vmem:[%s652_s2 + $0x50] sm:$0xff] %vm174_vm1, %v311_v45 }
 0x11a   :  { %328 = vst.msk [vmem:[%s652_s2 + $0x58] sm:$0xff] %vm174_vm1, %v312_v33 }
 0x11b   :  { %329 = vst.msk [vmem:[%s652_s2 + $0x60] sm:$0xff] %vm174_vm1, %v313_v50 }
 0x11c   :  { %330 = vst.msk [vmem:[%s652_s2 + $0x68] sm:$0xff] %vm174_vm1, %v314_v55 }
 0x11d   :  { %331 = vst.msk [vmem:[%s652_s2 + $0x70] sm:$0xff] %vm174_vm1, %v315_v58 }
 0x11e   :  { %332 = vst.msk [vmem:[%s652_s2 + $0x78] sm:$0xff] %vm174_vm1, %v316_v62 }
 0x11f   :  { %337 = vsyncpa [#allocation3], 1 }

</bundles_post_ra>
